<compile_context>
chip_gen: v5e
topology: v5e:2x2
jax: 0.10.0
libtpu: 0.0.40
codegen_flags: <defaults>
</compile_context>

<pallas_src>
import functools

import jax
import jax.numpy as jnp
from jax.experimental import pallas as pl
from jax.experimental.pallas import tpu as pltpu


def _default_vmem_limit():
    """Per-generation scoped-VMEM budget: ~3/4 of physical, capped at 96 MiB
    (v5e/v6e: 128 MiB physical -> 96 MiB; v7x: 64 MiB -> 48 MiB).  Falls back to a
    conservative 32 MiB if the hardware query is unavailable."""
    try:
        info = pltpu.get_tpu_info()
        cap = getattr(info, "vmem_capacity_bytes", None)
        if cap:
            return int(min(cap * 3 // 4, 96 * 1024 * 1024))
    except Exception:
        pass
    return 32 * 1024 * 1024


_VMEM_LIMIT = _default_vmem_limit()


def _row_block(oh, max_rows):
    """Largest divisor of `oh` that is <= max_rows, so row-blocked grids never read OOB."""
    for th in range(min(max_rows, oh), 0, -1):
        if oh % th == 0:
            return th
    return 1


# ------------------------------------------------------------------- Pallas: matmul
def _mm_kernel(x_ref, w_ref, b_ref, *rest, relu, has_res):
    if has_res:
        r_ref, o_ref = rest
    else:
        (o_ref,) = rest
    acc = jnp.dot(x_ref[...], w_ref[...], preferred_element_type=jnp.float32)
    acc = acc + b_ref[...]
    if has_res:
        acc = acc + r_ref[...].astype(jnp.float32)
    if relu:
        acc = jnp.maximum(acc, 0.0)
    o_ref[...] = acc.astype(o_ref.dtype)


def pallas_matmul(x, w, bias, *, relu=False, residual=None, out_dtype=jnp.bfloat16):
    """out = relu_opt(x @ w + bias (+ residual)).
    x:(M,K) bf16, w:(K,N) bf16, bias:(N,) f32, residual:(M,N) bf16 or None.
    K stays whole per block (a few K at most here); M/N are tiled, with tn up to 512 to cut
    weight re-streaming across M sweeps and keep the output slab lane-dense."""
    M, K = x.shape
    N = w.shape[1]
    tm = M if M <= 256 else 256
    tn = N if N <= 512 else 512
    bias2 = bias.reshape(1, N).astype(jnp.float32)
    has_res = residual is not None

    in_specs = [
        pl.BlockSpec((tm, K), lambda i, j: (i, 0)),
        pl.BlockSpec((K, tn), lambda i, j: (0, j)),
        pl.BlockSpec((1, tn), lambda i, j: (0, j)),
    ]
    args = [x, w, bias2]
    if has_res:
        in_specs.append(pl.BlockSpec((tm, tn), lambda i, j: (i, j)))
        args.append(residual)

    # TODO(synk): layer3/4 weight streaming could additionally use int8 (v5e/v6e) or fp8
    # (v7x) weights with dequant in this epilogue; kept bf16 here for portability.
    return pl.pallas_call(
        functools.partial(_mm_kernel, relu=relu, has_res=has_res),
        out_shape=jax.ShapeDtypeStruct((M, N), out_dtype),
        grid_spec=pltpu.PrefetchScalarGridSpec(
            num_scalar_prefetch=0,
            grid=(pl.cdiv(M, tm), pl.cdiv(N, tn)),
            in_specs=in_specs,
            out_specs=pl.BlockSpec((tm, tn), lambda i, j: (i, j)),
        ),
        compiler_params=pltpu.CompilerParams(
            dimension_semantics=("parallel", "parallel"),
            vmem_limit_bytes=_VMEM_LIMIT,
        ),
    )(*args)


# ----------------------------------------------------- Pallas: direct 3x3 conv (stride 1)
def _conv3x3_kernel(x_ref, w_ref, b_ref, o_ref, *, KH, KW, dil, OW, TH, relu):
    base = pl.program_id(2) * TH
    b = b_ref[...]
    for r in range(TH):
        acc = None
        for kh in range(KH):
            row = base + r + kh * dil
            for kw in range(KW):
                xs = x_ref[0, row, pl.ds(kw * dil, OW), :]            # (OW, Cin) bf16
                part = jnp.dot(xs, w_ref[kh, kw], preferred_element_type=jnp.float32)
                acc = part if acc is None else acc + part
        acc = acc + b
        if relu:
            acc = jnp.maximum(acc, 0.0)
        o_ref[0, r] = acc.astype(o_ref.dtype)


def conv3x3_bn_direct(x, w, bn, *, dilation=1, relu=True):
    """3x3 stride-1 conv + fused inference BN (+ReLU) computed directly from the padded
    NHWC image kept resident in VMEM (no im2col materialisation in HBM).
    Row-blocked: TH output rows per grid step amortize per-step overhead and produce large
    stores; the Cout-tile axis sits outside the row sweep so the weight tile stays resident
    across the whole image."""
    padding = dilation
    N, H, W, Cin = x.shape
    Cout, _, KH, KW = w.shape
    OH, OW = H, W
    Hp, Wp = H + 2 * padding, W + 2 * padding
    TH = _row_block(OH, 8)

    scale, bias = _bn_fold(bn)
    w4 = (jnp.transpose(w, (2, 3, 1, 0)) * scale[None, None, None, :]).astype(jnp.bfloat16)
    xp = jnp.pad(x, ((0, 0), (padding, padding), (padding, padding), (0, 0))).astype(jnp.bfloat16)
    bias2 = bias.reshape(1, Cout).astype(jnp.float32)
    tn = Cout if Cout <= 512 else 512

    # TODO(synk): for very high resolutions on v7x (64 MiB VMEM) the whole-image-resident
    # block should become an H-tile with a (KH-1)*dilation halo.
    return pl.pallas_call(
        functools.partial(_conv3x3_kernel, KH=KH, KW=KW, dil=dilation, OW=OW, TH=TH, relu=relu),
        out_shape=jax.ShapeDtypeStruct((N, OH, OW, Cout), jnp.bfloat16),
        grid_spec=pltpu.PrefetchScalarGridSpec(
            num_scalar_prefetch=0,
            grid=(N, pl.cdiv(Cout, tn), OH // TH),
            in_specs=[
                # whole padded image of one batch element stays resident in VMEM
                pl.BlockSpec((1, Hp, Wp, Cin), lambda n, j, i: (n, 0, 0, 0)),
                pl.BlockSpec((KH, KW, Cin, tn), lambda n, j, i: (0, 0, 0, j)),
                pl.BlockSpec((1, tn), lambda n, j, i: (0, j)),
            ],
            out_specs=pl.BlockSpec((1, TH, OW, tn), lambda n, j, i: (n, i, 0, j)),
        ),
        compiler_params=pltpu.CompilerParams(
            dimension_semantics=("parallel", "parallel", "parallel"),
            vmem_limit_bytes=_VMEM_LIMIT,
        ),
    )(xp, w4, bias2)


# ------------------------------------------ Pallas: AvgPool2d(2) fused into a 1x1 conv
def _pool_conv_kernel(x_ref, w_ref, b_ref, *rest, TH, relu, has_res):
    if has_res:
        r_ref, o_ref = rest
    else:
        (o_ref,) = rest
    base = pl.program_id(2) * TH
    w = w_ref[...]
    b = b_ref[...]
    for r in range(TH):
        rr = 2 * (base + r)
        # Column half of the 2x2 pool is folded into the weights via the free
        # (W,C)->(W/2,2C) wrapper reshape; only the two input rows need summing here.
        row = (x_ref[0, rr, :, :].astype(jnp.float32)
               + x_ref[0, rr + 1, :, :].astype(jnp.float32)).astype(jnp.bfloat16)
        acc = jnp.dot(row, w, preferred_element_type=jnp.float32) + b
        if has_res:
            acc = acc + r_ref[0, r].astype(jnp.float32)
        if relu:
            acc = jnp.maximum(acc, 0.0)
        o_ref[0, r] = acc.astype(o_ref.dtype)


def pool_conv1x1_bn(x, w, bn, *, relu, residual=None):
    """AvgPool2d(2) + 1x1 conv + BN (+ReLU, + fused residual add) in a single kernel.
    No relaid/pooled copy of the feature map is ever written to HBM."""
    N, H, W, Cin = x.shape
    assert H % 2 == 0 and W % 2 == 0
    Cout = w.shape[0]
    OH, OW = H // 2, W // 2
    TH = _row_block(OH, 16)

    scale, bias = _bn_fold(bn)
    wm = w[:, :, 0, 0].T * scale[None, :]                                 # (Cin, Cout) f32
    w2 = (jnp.concatenate([wm, wm], axis=0) * 0.25).astype(jnp.bfloat16)  # (2*Cin, Cout)
    x2 = x.reshape(N, H, OW, 2 * Cin).astype(jnp.bfloat16)                # free reshape
    bias2 = bias.reshape(1, Cout).astype(jnp.float32)
    tn = Cout if Cout <= 512 else 512
    has_res = residual is not None

    in_specs = [
        pl.BlockSpec((1, H, OW, 2 * Cin), lambda n, j, i: (n, 0, 0, 0)),
        pl.BlockSpec((2 * Cin, tn), lambda n, j, i: (0, j)),
        pl.BlockSpec((1, tn), lambda n, j, i: (0, j)),
    ]
    args = [x2, w2, bias2]
    if has_res:
        in_specs.append(pl.BlockSpec((1, TH, OW, tn), lambda n, j, i: (n, i, 0, j)))
        args.append(residual)

    return pl.pallas_call(
        functools.partial(_pool_conv_kernel, TH=TH, relu=relu, has_res=has_res),
        out_shape=jax.ShapeDtypeStruct((N, OH, OW, Cout), jnp.bfloat16),
        grid_spec=pltpu.PrefetchScalarGridSpec(
            num_scalar_prefetch=0,
            grid=(N, pl.cdiv(Cout, tn), OH // TH),
            in_specs=in_specs,
            out_specs=pl.BlockSpec((1, TH, OW, tn), lambda n, j, i: (n, i, 0, j)),
        ),
        compiler_params=pltpu.CompilerParams(
            dimension_semantics=("parallel", "parallel", "parallel"),
            vmem_limit_bytes=_VMEM_LIMIT,
        ),
    )(*args)


# ------------------------------------------------------------------ Pallas: attention
def _attn_kernel(q_ref, k_ref, v_ref, o_ref, *, scale):
    s = jnp.einsum("bqd,bkd->bqk", q_ref[...], k_ref[...],
                   preferred_element_type=jnp.float32) * scale
    s = s - jnp.max(s, axis=-1, keepdims=True)
    p = jnp.exp(s)
    p = p * pl.reciprocal(jnp.sum(p, axis=-1, keepdims=True))   # exact (approx=False)
    o_ref[...] = jnp.einsum("bqk,bkd->bqd", p.astype(v_ref.dtype), v_ref[...],
                            preferred_element_type=jnp.float32)


def pallas_attention(q, k, v, *, scale):
    """q:(B,1,Dh) bf16; k,v:(B,T,Dh) bf16 with B = batch*heads -> (B,1,Dh) f32.
    The whole problem fits VMEM (T is tiny), so every batch/head runs in one grid step."""
    B, _, Dh = q.shape
    T = k.shape[1]
    return pl.pallas_call(
        functools.partial(_attn_kernel, scale=scale),
        out_shape=jax.ShapeDtypeStruct((B, 1, Dh), jnp.float32),
        grid_spec=pltpu.PrefetchScalarGridSpec(
            num_scalar_prefetch=0,
            grid=(1,),
            in_specs=[
                pl.BlockSpec((B, 1, Dh), lambda i: (0, 0, 0)),
                pl.BlockSpec((B, T, Dh), lambda i: (0, 0, 0)),
                pl.BlockSpec((B, T, Dh), lambda i: (0, 0, 0)),
            ],
            out_specs=pl.BlockSpec((B, 1, Dh), lambda i: (0, 0, 0)),
        ),
        compiler_params=pltpu.CompilerParams(
            dimension_semantics=("arbitrary",),
            vmem_limit_bytes=_VMEM_LIMIT,
        ),
    )(q, k, v)


# ------------------------------------------------------------------- conv + BN glue
def _bn_fold(bn, eps=1e-5):
    scale = bn["gamma"] / jnp.sqrt(bn["var"] + eps)
    bias = bn["beta"] - bn["mean"] * scale
    return scale, bias


def conv1x1_bn(x, w, bn, *, relu, residual=None):
    """1x1 conv + BN (+ReLU, + fused residual add): pure Pallas matmul."""
    N, H, W, Cin = x.shape
    Cout = w.shape[0]
    scale, bias = _bn_fold(bn)
    wmat = (w[:, :, 0, 0].T * scale[None, :]).astype(jnp.bfloat16)      # (Cin, Cout)
    res = None if residual is None else residual.reshape(N * H * W, Cout).astype(jnp.bfloat16)
    out = pallas_matmul(x.reshape(N * H * W, Cin).astype(jnp.bfloat16), wmat, bias,
                        relu=relu, residual=res)
    return out.reshape(N, H, W, Cout)


def conv_im2col_bn(x, w, bn, *, stride, padding, dilation=1, relu):
    """Conv via im2col + Pallas matmul.  Used where im2col has no meaningful data blow-up
    and gives proper MXU shapes: the 3-channel stem conv1 (K=27) and 3x3 conv2 on small
    (<=14x14) late-stage maps (K = 9*Cin, M = N*OH*OW).
    # TODO(synk): patch extraction is XLA strided slices + concat in HBM, not in-kernel."""
    N, H, W, Cin = x.shape
    Cout, _, KH, KW = w.shape
    OH = (H + 2 * padding - dilation * (KH - 1) - 1) // stride + 1
    OW = (W + 2 * padding - dilation * (KW - 1) - 1) // stride + 1
    xp = jnp.pad(x, ((0, 0), (padding, padding), (padding, padding), (0, 0))).astype(jnp.bfloat16)
    cols = []
    for kh in range(KH):
        for kw in range(KW):
            h0, w0 = kh * dilation, kw * dilation
            cols.append(xp[:, h0: h0 + (OH - 1) * stride + 1: stride,
                              w0: w0 + (OW - 1) * stride + 1: stride, :])
    patches = jnp.concatenate(cols, axis=-1).reshape(N * OH * OW, KH * KW * Cin)
    scale, bias = _bn_fold(bn)
    wmat = (jnp.transpose(w, (2, 3, 1, 0)).reshape(KH * KW * Cin, Cout)
            * scale[None, :]).astype(jnp.bfloat16)
    out = pallas_matmul(patches, wmat, bias, relu=relu)
    return out.reshape(N, OH, OW, Cout)


def conv3x3_bn(x, w, bn, *, dilation=1, relu=True):
    """Dispatch for 3x3 stride-1 convs: small spatial maps (layers 3/4 style) go to the
    im2col matmul (K = 9*Cin feeds the 256-wide MXU far better than 7/14-row dots); large
    maps use the direct in-VMEM kernel."""
    _, H, W, _ = x.shape
    if H * W <= 196:
        return conv_im2col_bn(x, w, bn, stride=1, padding=dilation, dilation=dilation, relu=relu)
    return conv3x3_bn_direct(x, w, bn, dilation=dilation, relu=relu)


# ------------------------------------------------------------------- parameter init
def _init_conv(key, cout, cin, kh, kw):
    return jax.random.normal(key, (cout, cin, kh, kw), jnp.float32) * ((cin * kh * kw) ** -0.5)


def _init_bn(key, c):
    k1, k2, k3, k4 = jax.random.split(key, 4)
    return {
        "gamma": 1.0 + 0.1 * jax.random.normal(k1, (c,), jnp.float32),
        "beta": 0.1 * jax.random.normal(k2, (c,), jnp.float32),
        "mean": 0.1 * jax.random.normal(k3, (c,), jnp.float32),
        "var": 1.0 + 0.1 * jnp.abs(jax.random.normal(k4, (c,), jnp.float32)),
    }


def _init_bottleneck(key, inplanes, planes, stride):
    keys = jax.random.split(key, 8)
    p = {
        "conv1": _init_conv(keys[0], planes, inplanes, 1, 1),
        "bn1": _init_bn(keys[1], planes),
        "conv2": _init_conv(keys[2], planes, planes, 3, 3),
        "bn2": _init_bn(keys[3], planes),
        "conv3": _init_conv(keys[4], planes * 4, planes, 1, 1),
        "bn3": _init_bn(keys[5], planes * 4),
    }
    if stride > 1 or inplanes != planes * 4:
        p["down_conv"] = _init_conv(keys[6], planes * 4, inplanes, 1, 1)
        p["down_bn"] = _init_bn(keys[7], planes * 4)
    return p


def init_modified_resnet(key, layers, output_dim, heads, input_resolution, width,
                         replace_stride_with_dilation=(False, False, True)):
    keys = iter(jax.random.split(key, 256))
    params = {
        "conv1": _init_conv(next(keys), width // 2, 3, 3, 3),
        "bn1": _init_bn(next(keys), width // 2),
        "conv2": _init_conv(next(keys), width // 2, width // 2, 3, 3),
        "bn2": _init_bn(next(keys), width // 2),
        "conv3": _init_conv(next(keys), width, width // 2, 3, 3),
        "bn3": _init_bn(next(keys), width),
    }
    cfg = {"heads": heads}
    inplanes, dilation = width, 1
    layer_strides = [1, 2, 2, 2]
    layer_dilate = [False] + list(replace_stride_with_dilation)
    for li in range(4):
        planes = width * (2 ** li)
        blocks = layers[li]
        stride, dilate = layer_strides[li], layer_dilate[li]
        prev_dil = dilation
        if dilate:
            dilation *= stride
            stride = 1
        # mirrors the module's _make_layer: first block (dilation=1), middle blocks with
        # previous_dilation, and an always-appended final block with the current dilation
        block_cfgs = [(inplanes, planes, stride, 1)]
        inplanes = planes * 4
        for _ in range(1, blocks - 1):
            block_cfgs.append((inplanes, planes, 1, prev_dil))
        block_cfgs.append((inplanes, planes, 1, dilation))
        bparams = [_init_bottleneck(next(keys), inp, pln, st) for (inp, pln, st, _d) in block_cfgs]
        params[f"layer{li + 1}"] = bparams
        cfg[f"layer{li + 1}"] = block_cfgs
    embed_dim = width * 32
    spacial = input_resolution // 32
    ap = {"pos": jax.random.normal(next(keys), (spacial * spacial + 1, embed_dim),
                                   jnp.float32) / (embed_dim ** 0.5)}
    for name, dout in [("q", embed_dim), ("k", embed_dim), ("v", embed_dim),
                       ("c", output_dim or embed_dim)]:
        ap[name + "_w"] = jax.random.normal(next(keys), (dout, embed_dim), jnp.float32) * (embed_dim ** -0.5)
        ap[name + "_b"] = 0.01 * jax.random.normal(next(keys), (dout,), jnp.float32)
    params["attnpool"] = ap
    return params, cfg


# ------------------------------------------------------------------------- forward
def bottleneck_forward(x, p, stride, dilation, pre_pool=False):
    # conv1 (1x1) + BN + ReLU; for layer1-block1 the stem AvgPool2d(2) is folded in here
    if pre_pool:
        out = pool_conv1x1_bn(x, p["conv1"], p["bn1"], relu=True)
    else:
        out = conv1x1_bn(x, p["conv1"], p["bn1"], relu=True)
    # conv2 (3x3) + BN + ReLU
    out = conv3x3_bn(out, p["conv2"], p["bn2"], dilation=dilation, relu=True)
    # identity path (downsample = AvgPool + 1x1 conv + BN when present)
    if "down_conv" in p:
        if stride > 1 or pre_pool:
            identity = pool_conv1x1_bn(x, p["down_conv"], p["down_bn"], relu=False)
        else:
            identity = conv1x1_bn(x, p["down_conv"], p["down_bn"], relu=False)
    else:
        identity = x
    # conv3 (1x1; avgpool-folded when strided) + BN, with the residual add + ReLU fused
    # in the matmul epilogue -- no standalone add_relu pass / extra HBM round trip.
    if stride > 1:
        assert stride == 2
        return pool_conv1x1_bn(out, p["conv3"], p["bn3"], relu=True, residual=identity)
    return conv1x1_bn(out, p["conv3"], p["bn3"], relu=True, residual=identity)


def attention_pool(x, ap, heads):
    N, H, W, C = x.shape
    tokens = x.reshape(N, H * W, C).astype(jnp.float32)      # matches NCHW (H,W) row-major flatten
    mean_tok = jnp.mean(tokens, axis=1, keepdims=True)       # glue: tiny reduction
    tok = jnp.concatenate([mean_tok, tokens], axis=1) + ap["pos"][None, :, :]
    T = tok.shape[1]
    # fused q/k/v projection: one Pallas matmul over all tokens
    w_qkv = jnp.concatenate([ap["q_w"].T, ap["k_w"].T, ap["v_w"].T], axis=1).astype(jnp.bfloat16)
    b_qkv = jnp.concatenate([ap["q_b"], ap["k_b"], ap["v_b"]])
    qkv = pallas_matmul(tok.reshape(N * T, C).astype(jnp.bfloat16), w_qkv, b_qkv,
                        relu=False, out_dtype=jnp.bfloat16).reshape(N, T, 3 * C)
    Dh = C // heads
    # only token 0 is queried (the module returns x[0] of the full attention -- identical)
    q = qkv[:, 0, :C].reshape(N * heads, 1, Dh)
    k = qkv[:, :, C:2 * C].reshape(N, T, heads, Dh).transpose(0, 2, 1, 3).reshape(N * heads, T, Dh)
    v = qkv[:, :, 2 * C:].reshape(N, T, heads, Dh).transpose(0, 2, 1, 3).reshape(N * heads, T, Dh)
    attn = pallas_attention(q, k, v, scale=Dh ** -0.5).reshape(N, C)
    return pallas_matmul(attn.astype(jnp.bfloat16), ap["c_w"].T.astype(jnp.bfloat16),
                         ap["c_b"], relu=False, out_dtype=jnp.float32)


def modified_resnet_forward(params, cfg, x_nchw):
    x = jnp.transpose(x_nchw, (0, 2, 3, 1)).astype(jnp.bfloat16)   # NCHW -> NHWC, bf16 activations
    # stem (the trailing AvgPool2d(2) is folded into layer1-block1's 1x1 convs)
    x = conv_im2col_bn(x, params["conv1"], params["bn1"], stride=2, padding=1, relu=True)
    x = conv3x3_bn(x, params["conv2"], params["bn2"], dilation=1, relu=True)
    x = conv3x3_bn(x, params["conv3"], params["bn3"], dilation=1, relu=True)
    # residual stages
    for li in range(4):
        for bi, (bp, (_inp, _pln, stride, dil)) in enumerate(
                zip(params[f"layer{li + 1}"], cfg[f"layer{li + 1}"])):
            x = bottleneck_forward(x, bp, stride, dil, pre_pool=(li == 0 and bi == 0))
    # attention pool
    return attention_pool(x, params["attnpool"], cfg["heads"])


# ---------------------------------------------------------------------------- main
if __name__ == "__main__":
    # Small config: width=16 -> embed_dim=512; layers=(1,1,1,1) gives 2 bottlenecks/stage
    # (mirrors the module's _make_layer, which always appends a final block).
    # input_resolution=64 with a 32x32 image: with replace_stride_with_dilation=[F,F,T],
    # layer4 keeps a 2x2 spatial map -> attnpool positional embedding of (64//32)^2+1 = 5 tokens.
    layers = (1, 1, 1, 1)
    width = 16
    heads = 8
    output_dim = 64
    input_resolution = 64

    params, cfg = init_modified_resnet(
        jax.random.PRNGKey(0), layers, output_dim, heads, input_resolution, width,
        replace_stride_with_dilation=(False, False, True),
    )

    x = jax.random.normal(jax.random.PRNGKey(0), (2, 3, 32, 32), jnp.float32)  # NCHW like PyTorch

    y = modified_resnet_forward(params, cfg, x)
    y = jax.block_until_ready(y)
    assert y.shape == (2, output_dim), y.shape
    print("KERNEL_OK")
</pallas_src>

<mosaic_0001>
module attributes {stable_mosaic.version = 11 : i64} {
  func.func @_mm_kernel(%arg0: i32, %arg1: i32, %arg2: memref<256x27xbf16, #tpu.memory_space<vmem>>, %arg3: memref<27x8xbf16, #tpu.memory_space<vmem>>, %arg4: memref<1x8xf32, #tpu.memory_space<vmem>>, %arg5: memref<256x8xbf16, #tpu.memory_space<vmem>>) attributes {dimension_semantics = [#tpu.dimension_semantics<parallel>, #tpu.dimension_semantics<parallel>], iteration_bounds = array<i64: 2, 1>, scalar_prefetch = 0 : i64, scratch_operands = 0 : i64, tpu.core_type = #tpu.core_type<tc>, window_params = [{transform_indices = @transform_0, window_bounds = array<i64: 256, 27>}, {transform_indices = @transform_1, window_bounds = array<i64: 27, 8>}, {transform_indices = @transform_2, window_bounds = array<i64: 1, 8>}, {transform_indices = @transform_3, window_bounds = array<i64: 256, 8>}]} {
    %c0 = arith.constant 0 : index
    %c0_0 = arith.constant 0 : index
    %0 = vector.load %arg2[%c0, %c0_0] : memref<256x27xbf16, #tpu.memory_space<vmem>>, vector<256x27xbf16>
    %c0_1 = arith.constant 0 : index
    %c0_2 = arith.constant 0 : index
    %1 = vector.load %arg3[%c0_1, %c0_2] : memref<27x8xbf16, #tpu.memory_space<vmem>>, vector<27x8xbf16>
    %cst = arith.constant dense<0.000000e+00> : vector<256x8xf32>
    %2 = tpu.matmul %0, %1, %cst {dimension_numbers = #tpu.dot_dimension_numbers<[1], [0], [0], [1], [0, 0, 1, 1], [], []>} : vector<256x27xbf16>, vector<27x8xbf16>, vector<256x8xf32> -> vector<256x8xf32>
    %c0_3 = arith.constant 0 : index
    %c0_4 = arith.constant 0 : index
    %3 = vector.load %arg4[%c0_3, %c0_4] : memref<1x8xf32, #tpu.memory_space<vmem>>, vector<1x8xf32>
    %4 = vector.broadcast %3 : vector<1x8xf32> to vector<256x8xf32>
    %5 = arith.addf %2, %4 : vector<256x8xf32>
    %cst_5 = arith.constant 0.000000e+00 : f32
    %6 = vector.broadcast %cst_5 : f32 to vector<256x8xf32>
    %7 = arith.maximumf %5, %6 : vector<256x8xf32>
    %8 = arith.truncf %7 : vector<256x8xf32> to vector<256x8xbf16>
    %c0_6 = arith.constant 0 : index
    %c0_7 = arith.constant 0 : index
    %9 = vector.load %arg5[%c0_6, %c0_7] : memref<256x8xbf16, #tpu.memory_space<vmem>>, vector<256x8xbf16>
    tpu.vector_store %arg5[%c0_6, %c0_7], %8 {strides = array<i32>} : memref<256x8xbf16, #tpu.memory_space<vmem>>, vector<256x8xbf16>,
    return
  }
  func.func @transform_0(%arg0: i32, %arg1: i32) -> (i32, i32) {
    %c0_i32 = arith.constant 0 : i32
    %c0_i32_0 = arith.constant 0 : i32
    return %arg0, %c0_i32 : i32, i32
  }
  func.func @transform_1(%arg0: i32, %arg1: i32) -> (i32, i32) {
    %c0_i32 = arith.constant 0 : i32
    %c0_i32_0 = arith.constant 0 : i32
    return %c0_i32, %arg1 : i32, i32
  }
  func.func @transform_2(%arg0: i32, %arg1: i32) -> (i32, i32) {
    %c0_i32 = arith.constant 0 : i32
    %c0_i32_0 = arith.constant 0 : i32
    return %c0_i32, %arg1 : i32, i32
  }
  func.func @transform_3(%arg0: i32, %arg1: i32) -> (i32, i32) {
    %c0_i32 = arith.constant 0 : i32
    return %arg0, %arg1 : i32, i32
  }
}

</mosaic_0001>

<bundles_post_ra>
// kernel: tpu_custom_call.1
= control target key start
LH: loop header
LB: loop body
LE: loop exit
PB: predicated region body
PF: predicated region fallthrough
CT: control target
= control target key end

     0   :  { %s897_s12 = smov 0   ;;  %s899_s13 = smov 0   ;;  %s1083_s0 = inlined_call_operand.vmem [shape: bf16[512,27], index: 0, kind: input, shape index: {}]   ;;  %s1084_s1 = inlined_call_operand.vmem [shape: bf16[27,8], index: 1, kind: input, shape index: {}]   ;;  %s1085_s2 = inlined_call_operand.vmem [shape: f32[1,8], index: 2, kind: input, shape index: {}]   ;;  %s1086_s3 = inlined_call_operand.vmem [shape: bf16[512,8], index: 3, kind: output, shape index: {}]  }
   0x1   :  { %s901_s14 = smov 0  }
   0x2 LB: > { %s25_s15 = sadd.s32 1, %s870_s13  ;;  %p707_p0 = scmp.ge.s32.totalorder %s874_s14, 1  ;;  %s874_s14 = sphi %s901_s14, %s13_s14   ;;  %s870_s13 = sphi %s899_s13, %s1088_s13   ;;  %s866_s12 = sphi %s897_s12, %s1087_s12  }
   0x3   : > { %p27_p1 = scmp.ge.s32.totalorder %s25_s15, 2  ;;  %p169_p2 = scmp.lt.s32.totalorder %s874_s14, 3 }
   0x5   : > { %s1090_s15 = smov (%p27_p1, %s25_s15), 0  ;;  %p170_p3 = pnand %p707_p0, %p169_p2 }
   0x6   : > { %s708_s20 = sshll.u32 (!%p170_p3), %s866_s12, 5 }
   0x7   : > { %173 = sbr.rel (%p170_p3) target bundleno = 222 (0xde), region = 32  ;;  %p204_p4 = scmp.lt.s32.totalorder (!%p170_p3), %s708_s20, 63 }
   0xc   : > { %v782_v0 = vld [vmem:[%s1084_s1 + $0x8] sm:$0xf]  ;;  %v819_v1 = vld [vmem:[%s1084_s1 + $0x8] sm:$0x30]  ;;  %vm406_vm0 = vcmask 1044480   ;;  %vm407_vm1 = vcmask 1045504  }
   0xd   : > { %v783_v2 = vor.u32 %v819_v1, %v782_v0  ;;  %v876_v3 = vmov 65535   ;;  %s1092_s20 = smov (!%p204_p4, %s708_s20), 63  ;;  %v818_v7 = vld [vmem:[%s1084_s1] sm:$0xff]  ;;  %vm357_vm2 = vcmask 220160   ;;  %vm566_vm3 = vcmask 60416  }
   0xe   : > { %v408_v4 = vsel %vm406_vm0, 4294967295, %v876_v3  ;;  %s709_s23 = sshll.u32 %s1092_s20, 2  ;;  %v969_v24 = vld [vmem:[%s1085_s2] ss:$0 sm:$0xff] }
   0xf   : > { %v409_v5 = vsel %vm407_vm1, %v408_v4, 0  ;;  %s932_s26 = scalar_lea.vmem %s1083_s0, %s709_s23  ;;  %s978_s4 = scalar_lea.vmem %s1086_s3, %s709_s23 }
  0x10   : > { %v411_v6 = vand.u32 %v783_v2, %v409_v5  ;;  %v802_v8 = vld [vmem:[%s932_s26] sm:$0xff]  ;;  %v803_v12 = vld [vmem:[%s932_s26 + $0x8] sm:$0xff]  ;;  %v804_v16 = vld [vmem:[%s932_s26 + $0x10] sm:$0xff] }
  0x11   : > { %v806_v9 = vld [vmem:[%s932_s26 + $0x20] sm:$0xff]  ;;  %v807_v13 = vld [vmem:[%s932_s26 + $0x28] sm:$0xff]  ;;  %v808_v17 = vld [vmem:[%s932_s26 + $0x30] sm:$0xff] }
  0x12   : > { %419 = vmatpush.bf16.msra.mxu0 %v411_v6  ;;  %820 = vmatpush.bf16.msra.mxu1 %v411_v6  ;;  %v810_v10 = vld [vmem:[%s932_s26 + $0x40] sm:$0xff]  ;;  %v811_v14 = vld [vmem:[%s932_s26 + $0x48] sm:$0xff]  ;;  %v812_v18 = vld [vmem:[%s932_s26 + $0x50] sm:$0xff] }
  0x13   : > { %821 = vmatpush.bf16.msra.mxu2 %v411_v6  ;;  %822 = vmatpush.bf16.msra.mxu3 %v411_v6  ;;  %v814_v11 = vld [vmem:[%s932_s26 + $0x60] sm:$0xff]  ;;  %v815_v15 = vld [vmem:[%s932_s26 + $0x68] sm:$0xff]  ;;  %v816_v19 = vld [vmem:[%s932_s26 + $0x70] sm:$0xff] }
  0x14   : > { %v805_v20 = vld [vmem:[%s932_s26 + $0x18] sm:$0xff] }
  0x15   : > { %v809_v21 = vld [vmem:[%s932_s26 + $0x38] sm:$0xff] }
  0x16   : > { %420 = vmatpush.bf16.msra.mxu0 %v818_v7  ;;  %823 = vmatpush.bf16.msra.mxu1 %v818_v7  ;;  %v813_v22 = vld [vmem:[%s932_s26 + $0x58] sm:$0xff] }
  0x17   : > { %824 = vmatpush.bf16.msra.mxu2 %v818_v7  ;;  %825 = vmatpush.bf16.msra.mxu3 %v818_v7  ;;  %v817_v23 = vld [vmem:[%s932_s26 + $0x78] sm:$0xff] }
  0x19   : > { %784 = vmatmul.msk.bf16.vlgmr.msra.gmra.mxu0 %vm357_vm2, %v802_v8  ;;  %788 = vmatmul.msk.bf16.vlgmr.msra.gmra.mxu1 %vm357_vm2, %v806_v9 }
  0x1a   : > { %792 = vmatmul.msk.bf16.vlgmr.msra.gmra.mxu2 %vm357_vm2, %v810_v10  ;;  %796 = vmatmul.msk.bf16.vlgmr.msra.gmra.mxu3 %vm357_vm2, %v814_v11 }
  0x29   : > { %785 = vmatmul.msk.bf16.gmra.mxu0 %vm357_vm2, %v803_v12  ;;  %789 = vmatmul.msk.bf16.gmra.mxu1 %vm357_vm2, %v807_v13 }
  0x2a   : > { %793 = vmatmul.msk.bf16.gmra.mxu2 %vm357_vm2, %v811_v14  ;;  %797 = vmatmul.msk.bf16.gmra.mxu3 %vm357_vm2, %v815_v15 }
  0x39   : > { %786 = vmatmul.msk.bf16.gmra.mxu0 %vm357_vm2, %v804_v16  ;;  %790 = vmatmul.msk.bf16.gmra.mxu1 %vm357_vm2, %v808_v17 }
  0x3a   : > { %794 = vmatmul.msk.bf16.gmra.mxu2 %vm357_vm2, %v812_v18  ;;  %798 = vmatmul.msk.bf16.gmra.mxu3 %vm357_vm2, %v816_v19 }
  0x49   : > { %787 = vmatmul.msk.bf16.gmra.mxu0 %vm357_vm2, %v805_v20  ;;  %791 = vmatmul.msk.bf16.gmra.mxu1 %vm357_vm2, %v809_v21 }
  0x4a   : > { %795 = vmatmul.msk.bf16.gmra.mxu2 %vm357_vm2, %v813_v22  ;;  %799 = vmatmul.msk.bf16.gmra.mxu3 %vm357_vm2, %v817_v23 }
  0x96   : > { %v422_v25 = vpop.f32.mrf.mxu0  ;;  %v442_v26 = vpop.f32.mrf.mxu1 }
  0x97   : > { %v423_v27 = vadd.f32 %v969_v24, %v422_v25  ;;  %v443_v28 = vadd.f32 %v969_v24, %v442_v26 }
  0x99   : > { %v502_v29 = vmax.f32 %v423_v27, 0.0  ;;  %v510_v30 = vmax.f32 %v443_v28, 0.0 }
  0x9b   : > { %v534_v31 = vpack.c.bf16 %v502_v29, %v502_v29  ;;  %v542_v32 = vpack.c.bf16 %v510_v30, %v510_v30 }
  0x9d   : > { %567 = vst.msk [vmem:[%s978_s4] sm:$0xf] %vm566_vm3, %v534_v31  ;;  %v462_v33 = vpop.f32.mrf.mxu2  ;;  %v482_v34 = vpop.f32.mrf.mxu3 }
  0x9e   : > { %575 = vst.msk [vmem:[%s978_s4 + $0x20] sm:$0xf] %vm566_vm3, %v542_v32  ;;  %v463_v35 = vadd.f32 %v969_v24, %v462_v33  ;;  %v483_v36 = vadd.f32 %v969_v24, %v482_v34  ;;  %v424_v37 = vpop.f32.mrf.mxu0  ;;  %v444_v38 = vpop.f32.mrf.mxu1 }
  0x9f   : > { %v425_v39 = vadd.f32 %v969_v24, %v424_v37  ;;  %v445_v40 = vadd.f32 %v969_v24, %v444_v38 }
  0xa0   : > { %v518_v41 = vmax.f32 %v463_v35, 0.0  ;;  %v526_v42 = vmax.f32 %v483_v36, 0.0 }
  0xa1   : > { %v503_v43 = vmax.f32 %v425_v39, 0.0  ;;  %v511_v44 = vmax.f32 %v445_v40, 0.0 }
  0xa2   : > { %v550_v45 = vpack.c.bf16 %v518_v41, %v518_v41  ;;  %v558_v46 = vpack.c.bf16 %v526_v42, %v526_v42 }
  0xa3   : > { %v535_v47 = vpack.c.bf16 %v503_v43, %v503_v43  ;;  %v543_v48 = vpack.c.bf16 %v511_v44, %v511_v44 }
  0xa4   : > { %583 = vst.msk [vmem:[%s978_s4 + $0x40] sm:$0xf] %vm566_vm3, %v550_v45 }
  0xa5   : > { %591 = vst.msk [vmem:[%s978_s4 + $0x60] sm:$0xf] %vm566_vm3, %v558_v46  ;;  %v464_v49 = vpop.f32.mrf.mxu2  ;;  %v484_v50 = vpop.f32.mrf.mxu3 }
  0xa6   : > { %568 = vst.msk [vmem:[%s978_s4 + $0x4] sm:$0xf] %vm566_vm3, %v535_v47  ;;  %v465_v51 = vadd.f32 %v969_v24, %v464_v49  ;;  %v485_v52 = vadd.f32 %v969_v24, %v484_v50  ;;  %v427_v53 = vpop.f32.mrf.mxu0  ;;  %v447_v54 = vpop.f32.mrf.mxu1 }
  0xa7   : > { %576 = vst.msk [vmem:[%s978_s4 + $0x24] sm:$0xf] %vm566_vm3, %v543_v48  ;;  %v428_v55 = vadd.f32 %v969_v24, %v427_v53  ;;  %v448_v56 = vadd.f32 %v969_v24, %v447_v54 }
  0xa8   : > { %v519_v57 = vmax.f32 %v465_v51, 0.0  ;;  %v527_v58 = vmax.f32 %v485_v52, 0.0 }
  0xa9   : > { %v504_v59 = vmax.f32 %v428_v55, 0.0  ;;  %v512_v60 = vmax.f32 %v448_v56, 0.0 }
  0xaa   : > { %v551_v61 = vpack.c.bf16 %v519_v57, %v519_v57  ;;  %v559_v62 = vpack.c.bf16 %v527_v58, %v527_v58 }
  0xab   : > { %v536_v63 = vpack.c.bf16 %v504_v59, %v504_v59  ;;  %v544_v0 = vpack.c.bf16 %v512_v60, %v512_v60 }
  0xac   : > { %584 = vst.msk [vmem:[%s978_s4 + $0x44] sm:$0xf] %vm566_vm3, %v551_v61 }
  0xad   : > { %592 = vst.msk [vmem:[%s978_s4 + $0x64] sm:$0xf] %vm566_vm3, %v559_v62  ;;  %v467_v1 = vpop.f32.mrf.mxu2  ;;  %v487_v2 = vpop.f32.mrf.mxu3 }
  0xae   : > { %569 = vst.msk [vmem:[%s978_s4 + $0x8] sm:$0xf] %vm566_vm3, %v536_v63  ;;  %v468_v3 = vadd.f32 %v969_v24, %v467_v1  ;;  %v488_v4 = vadd.f32 %v969_v24, %v487_v2  ;;  %v429_v5 = vpop.f32.mrf.mxu0  ;;  %v449_v6 = vpop.f32.mrf.mxu1 }
  0xaf   : > { %577 = vst.msk [vmem:[%s978_s4 + $0x28] sm:$0xf] %vm566_vm3, %v544_v0  ;;  %v430_v7 = vadd.f32 %v969_v24, %v429_v5  ;;  %v450_v8 = vadd.f32 %v969_v24, %v449_v6 }
  0xb0   : > { %v520_v9 = vmax.f32 %v468_v3, 0.0  ;;  %v528_v10 = vmax.f32 %v488_v4, 0.0 }
  0xb1   : > { %v505_v11 = vmax.f32 %v430_v7, 0.0  ;;  %v513_v12 = vmax.f32 %v450_v8, 0.0 }
  0xb2   : > { %v552_v13 = vpack.c.bf16 %v520_v9, %v520_v9  ;;  %v560_v14 = vpack.c.bf16 %v528_v10, %v528_v10 }
  0xb3   : > { %v537_v15 = vpack.c.bf16 %v505_v11, %v505_v11  ;;  %v545_v16 = vpack.c.bf16 %v513_v12, %v513_v12 }
  0xb4   : > { %585 = vst.msk [vmem:[%s978_s4 + $0x48] sm:$0xf] %vm566_vm3, %v552_v13 }
  0xb5   : > { %593 = vst.msk [vmem:[%s978_s4 + $0x68] sm:$0xf] %vm566_vm3, %v560_v14  ;;  %v469_v17 = vpop.f32.mrf.mxu2  ;;  %v489_v18 = vpop.f32.mrf.mxu3 }
  0xb6   : > { %570 = vst.msk [vmem:[%s978_s4 + $0xc] sm:$0xf] %vm566_vm3, %v537_v15  ;;  %v470_v19 = vadd.f32 %v969_v24, %v469_v17  ;;  %v490_v20 = vadd.f32 %v969_v24, %v489_v18  ;;  %v432_v21 = vpop.f32.mrf.mxu0  ;;  %v452_v22 = vpop.f32.mrf.mxu1 }
  0xb7   : > { %578 = vst.msk [vmem:[%s978_s4 + $0x2c] sm:$0xf] %vm566_vm3, %v545_v16  ;;  %v433_v23 = vadd.f32 %v969_v24, %v432_v21  ;;  %v453_v25 = vadd.f32 %v969_v24, %v452_v22 }
  0xb8   : > { %v521_v26 = vmax.f32 %v470_v19, 0.0  ;;  %v529_v27 = vmax.f32 %v490_v20, 0.0 }
  0xb9   : > { %v506_v28 = vmax.f32 %v433_v23, 0.0  ;;  %v514_v29 = vmax.f32 %v453_v25, 0.0 }
  0xba   : > { %v553_v30 = vpack.c.bf16 %v521_v26, %v521_v26  ;;  %v561_v31 = vpack.c.bf16 %v529_v27, %v529_v27 }
  0xbb   : > { %v538_v32 = vpack.c.bf16 %v506_v28, %v506_v28  ;;  %v546_v33 = vpack.c.bf16 %v514_v29, %v514_v29 }
  0xbc   : > { %586 = vst.msk [vmem:[%s978_s4 + $0x4c] sm:$0xf] %vm566_vm3, %v553_v30 }
  0xbd   : > { %594 = vst.msk [vmem:[%s978_s4 + $0x6c] sm:$0xf] %vm566_vm3, %v561_v31  ;;  %v472_v34 = vpop.f32.mrf.mxu2  ;;  %v492_v35 = vpop.f32.mrf.mxu3 }
  0xbe   : > { %571 = vst.msk [vmem:[%s978_s4 + $0x10] sm:$0xf] %vm566_vm3, %v538_v32  ;;  %v473_v36 = vadd.f32 %v969_v24, %v472_v34  ;;  %v493_v37 = vadd.f32 %v969_v24, %v492_v35  ;;  %v434_v38 = vpop.f32.mrf.mxu0  ;;  %v454_v39 = vpop.f32.mrf.mxu1 }
  0xbf   : > { %579 = vst.msk [vmem:[%s978_s4 + $0x30] sm:$0xf] %vm566_vm3, %v546_v33  ;;  %v435_v40 = vadd.f32 %v969_v24, %v434_v38  ;;  %v455_v41 = vadd.f32 %v969_v24, %v454_v39 }
  0xc0   : > { %v522_v42 = vmax.f32 %v473_v36, 0.0  ;;  %v530_v43 = vmax.f32 %v493_v37, 0.0 }
  0xc1   : > { %v507_v44 = vmax.f32 %v435_v40, 0.0  ;;  %v515_v45 = vmax.f32 %v455_v41, 0.0 }
  0xc2   : > { %v554_v46 = vpack.c.bf16 %v522_v42, %v522_v42  ;;  %v562_v47 = vpack.c.bf16 %v530_v43, %v530_v43 }
  0xc3   : > { %v539_v48 = vpack.c.bf16 %v507_v44, %v507_v44  ;;  %v547_v49 = vpack.c.bf16 %v515_v45, %v515_v45 }
  0xc4   : > { %587 = vst.msk [vmem:[%s978_s4 + $0x50] sm:$0xf] %vm566_vm3, %v554_v46 }
  0xc5   : > { %595 = vst.msk [vmem:[%s978_s4 + $0x70] sm:$0xf] %vm566_vm3, %v562_v47  ;;  %v474_v50 = vpop.f32.mrf.mxu2  ;;  %v494_v51 = vpop.f32.mrf.mxu3 }
  0xc6   : > { %572 = vst.msk [vmem:[%s978_s4 + $0x14] sm:$0xf] %vm566_vm3, %v539_v48  ;;  %v475_v52 = vadd.f32 %v969_v24, %v474_v50  ;;  %v495_v53 = vadd.f32 %v969_v24, %v494_v51  ;;  %v437_v54 = vpop.f32.mrf.mxu0  ;;  %v457_v55 = vpop.f32.mrf.mxu1 }
  0xc7   : > { %580 = vst.msk [vmem:[%s978_s4 + $0x34] sm:$0xf] %vm566_vm3, %v547_v49  ;;  %v438_v56 = vadd.f32 %v969_v24, %v437_v54  ;;  %v458_v57 = vadd.f32 %v969_v24, %v457_v55 }
  0xc8   : > { %v523_v58 = vmax.f32 %v475_v52, 0.0  ;;  %v531_v59 = vmax.f32 %v495_v53, 0.0 }
  0xc9   : > { %v508_v60 = vmax.f32 %v438_v56, 0.0  ;;  %v516_v61 = vmax.f32 %v458_v57, 0.0 }
  0xca   : > { %v555_v62 = vpack.c.bf16 %v523_v58, %v523_v58  ;;  %v563_v63 = vpack.c.bf16 %v531_v59, %v531_v59 }
  0xcb   : > { %v540_v0 = vpack.c.bf16 %v508_v60, %v508_v60  ;;  %v548_v1 = vpack.c.bf16 %v516_v61, %v516_v61 }
  0xcc   : > { %588 = vst.msk [vmem:[%s978_s4 + $0x54] sm:$0xf] %vm566_vm3, %v555_v62 }
  0xcd   : > { %596 = vst.msk [vmem:[%s978_s4 + $0x74] sm:$0xf] %vm566_vm3, %v563_v63  ;;  %v477_v2 = vpop.f32.mrf.mxu2  ;;  %v497_v3 = vpop.f32.mrf.mxu3 }
  0xce   : > { %573 = vst.msk [vmem:[%s978_s4 + $0x18] sm:$0xf] %vm566_vm3, %v540_v0  ;;  %v478_v4 = vadd.f32 %v969_v24, %v477_v2  ;;  %v498_v5 = vadd.f32 %v969_v24, %v497_v3  ;;  %v439_v6 = vpop.f32.mrf.mxu0  ;;  %v459_v7 = vpop.f32.mrf.mxu1 }
  0xcf   : > { %581 = vst.msk [vmem:[%s978_s4 + $0x38] sm:$0xf] %vm566_vm3, %v548_v1  ;;  %v440_v8 = vadd.f32 %v969_v24, %v439_v6  ;;  %v460_v9 = vadd.f32 %v969_v24, %v459_v7 }
  0xd0   : > { %v524_v10 = vmax.f32 %v478_v4, 0.0  ;;  %v532_v11 = vmax.f32 %v498_v5, 0.0 }
  0xd1   : > { %v509_v12 = vmax.f32 %v440_v8, 0.0  ;;  %v517_v13 = vmax.f32 %v460_v9, 0.0 }
  0xd2   : > { %v556_v14 = vpack.c.bf16 %v524_v10, %v524_v10  ;;  %v564_v15 = vpack.c.bf16 %v532_v11, %v532_v11 }
  0xd3   : > { %v541_v16 = vpack.c.bf16 %v509_v12, %v509_v12  ;;  %v549_v17 = vpack.c.bf16 %v517_v13, %v517_v13 }
  0xd4   : > { %589 = vst.msk [vmem:[%s978_s4 + $0x58] sm:$0xf] %vm566_vm3, %v556_v14 }
  0xd5   : > { %597 = vst.msk [vmem:[%s978_s4 + $0x78] sm:$0xf] %vm566_vm3, %v564_v15  ;;  %v479_v18 = vpop.f32.mrf.mxu2  ;;  %v499_v19 = vpop.f32.mrf.mxu3 }
  0xd6   : > { %574 = vst.msk [vmem:[%s978_s4 + $0x1c] sm:$0xf] %vm566_vm3, %v541_v16  ;;  %v480_v20 = vadd.f32 %v969_v24, %v479_v18  ;;  %v500_v21 = vadd.f32 %v969_v24, %v499_v19 }
  0xd7   : > { %582 = vst.msk [vmem:[%s978_s4 + $0x3c] sm:$0xf] %vm566_vm3, %v549_v17 }
  0xd8   : > { %v525_v22 = vmax.f32 %v480_v20, 0.0  ;;  %v533_v23 = vmax.f32 %v500_v21, 0.0 }
  0xda   : > { %v557_v25 = vpack.c.bf16 %v525_v22, %v525_v22  ;;  %v565_v26 = vpack.c.bf16 %v533_v23, %v533_v23 }
  0xdc   : > { %590 = vst.msk [vmem:[%s978_s4 + $0x5c] sm:$0xf] %vm566_vm3, %v557_v25 }
  0xdd   : > { %598 = vst.msk [vmem:[%s978_s4 + $0x7c] sm:$0xf] %vm566_vm3, %v565_v26 }
  0xde PF: > { %s13_s14 = sadd.s32 1, %s874_s14   ;;  %s1087_s12 = smov %s870_s13 }
  0xdf   : > { %p10_p5 = scmp.ge.s32.totalorder %s13_s14, 4   ;;  %s1088_s13 = smov %s1090_s15 }
  0xe1   :  { %12 = sbr.rel (!%p10_p5) target bundleno = 2 (0x2), region = 68 }

</bundles_post_ra>
